<compile_context>
chip_gen: v7x
topology: tpu7x:2x2x1
jax: 0.10.0
libtpu: 0.0.40
codegen_flags: <defaults>
</compile_context>

<pallas_src>
import jax
import jax.numpy as jnp
from jax.experimental import pallas as pl
from jax.experimental.pallas import tpu as pltpu


def _linreg_kernel(x_ref, w_ref, b_ref, o_ref):
    # x_ref: (TB, D) VMEM tile, w_ref: (1, D) VMEM (resident), b_ref: (1,) SMEM scalar,
    # o_ref: (TB, 1) VMEM tile.
    xf = x_ref[...].astype(jnp.float32)            # explicit f32 path (v5e has no bf16 VPU)
    wf = w_ref[...].astype(jnp.float32)            # (1, D), broadcasts over sublanes
    y = jnp.sum(xf * wf, axis=-1, keepdims=True)   # VPU multiply + XLU lane reduce -> (TB, 1)
    o_ref[...] = (y + b_ref[0]).astype(o_ref.dtype)


def linear_regression_forward(x, w, b, *, block_batch=8192):
    """y = x @ w.T + b, matching torch.nn.Linear(input_dim, 1).

    block_batch: rows per grid step when the batch is tiled.  Must be a multiple of 32
    (covers f32/bf16/int8 sublane packing).  Batches that fit inside one tile run as a
    single full-array block with no grid pipeline and no padding.
    """
    batch, input_dim = x.shape
    assert w.shape == (1, input_dim)
    assert block_batch % 32 == 0

    if batch <= block_batch:
        # Single block covering the whole array: block shape == array shape, so the
        # (8,128) divisibility rule does not apply and no padding is ever needed.
        tb = batch
    else:
        tb = block_batch
    num_tiles = pl.cdiv(batch, tb)   # ragged final tile (if any) is clipped on writeback

    # Bias as a single 32-bit SMEM scalar.
    b_smem = jnp.asarray(b, dtype=jnp.float32).reshape(1)

    # VMEM budget: double-buffered input + output blocks, each row lane-padded to 128
    # f32 lanes in VMEM (worst case), plus slack for the resident weight row.
    block_vmem_bytes = 2 * 2 * tb * 128 * 4
    vmem_limit_bytes = max(block_vmem_bytes + (2 << 20), 16 << 20)

    # Advisory cost hint so XLA schedules around this memory-bound custom call sensibly.
    cost = pl.CostEstimate(
        flops=2 * batch * input_dim,
        transcendentals=0,
        bytes_accessed=(x.size * x.dtype.itemsize
                        + w.size * w.dtype.itemsize
                        + batch * x.dtype.itemsize),
    )

    out = pl.pallas_call(
        _linreg_kernel,
        out_shape=jax.ShapeDtypeStruct((batch, 1), x.dtype),
        grid_spec=pltpu.PrefetchScalarGridSpec(
            num_scalar_prefetch=0,
            grid=(num_tiles,),
            in_specs=[
                # x: one (TB, D) tile per grid step -> double-buffered DMA pipeline.
                pl.BlockSpec((tb, input_dim), lambda i: (i, 0)),
                # w: constant block index -> stays resident in VMEM across the grid.
                pl.BlockSpec((1, input_dim), lambda i: (0, 0)),
                # bias: whole (1,) array in SMEM.
                pl.BlockSpec(memory_space=pltpu.MemorySpace.SMEM),
            ],
            out_specs=pl.BlockSpec((tb, 1), lambda i: (i, 0)),
        ),
        compiler_params=pltpu.CompilerParams(
            # Batch tiles are independent -> shardable across TensorCores (v7x megacore).
            dimension_semantics=("parallel",),
            vmem_limit_bytes=vmem_limit_bytes,
        ),
        cost_estimate=cost,
    )(x, w, b_smem)

    return out


if __name__ == "__main__":
    # Housing-regression-like shapes (13 = Boston housing feature count).
    batch = 512
    input_dim = 13

    key = jax.random.PRNGKey(0)
    kx, kw, kb = jax.random.split(key, 3)

    x = jax.random.normal(kx, (batch, input_dim), dtype=jnp.float32)

    # Deterministic init matching nn.Linear default: U(-1/sqrt(fan_in), 1/sqrt(fan_in)).
    bound = 1.0 / (input_dim ** 0.5)
    w = jax.random.uniform(kw, (1, input_dim), dtype=jnp.float32,
                           minval=-bound, maxval=bound)
    b = jax.random.uniform(kb, (1,), dtype=jnp.float32,
                           minval=-bound, maxval=bound)

    # Reference (same math as nn.Linear, exact f32 elementwise path).
    y_ref = jnp.sum(x * w, axis=-1, keepdims=True) + b[None, :]

    # 1) Primary path: whole batch as a single full-array block (grid=(1,), no padding,
    #    no per-step pipeline overhead).
    y = linear_regression_forward(x, w, b)
    y = jax.block_until_ready(y)
    assert y.shape == (batch, 1)
    assert jnp.allclose(y, y_ref, atol=1e-5, rtol=1e-5)

    # 2) Tiled path: 4 evenly-divided batch tiles through the double-buffered pipeline.
    y_tiled = jax.block_until_ready(
        linear_regression_forward(x, w, b, block_batch=128))
    assert jnp.allclose(y_tiled, y_ref, atol=1e-5, rtol=1e-5)

    # 3) Ragged tiled path: batch not divisible by the tile; the final block is clipped
    #    on writeback (no jnp.pad copy anywhere).
    x_r, y_ref_r = x[:500], y_ref[:500]
    y_ragged = jax.block_until_ready(
        linear_regression_forward(x_r, w, b, block_batch=128))
    assert y_ragged.shape == (500, 1)
    assert jnp.allclose(y_ragged, y_ref_r, atol=1e-5, rtol=1e-5)

    print("KERNEL_OK")
</pallas_src>

<mosaic_0001>
module attributes {stable_mosaic.version = 11 : i64} {
  func.func @_linreg_kernel(%arg0: i32, %arg1: memref<512x13xf32, #tpu.memory_space<vmem>>, %arg2: memref<1x13xf32, #tpu.memory_space<vmem>>, %arg3: memref<1xf32, #tpu.memory_space<smem>>, %arg4: memref<512x1xf32, #tpu.memory_space<vmem>>) attributes {dimension_semantics = [#tpu.dimension_semantics<parallel>], iteration_bounds = array<i64: 1>, scalar_prefetch = 0 : i64, scratch_operands = 0 : i64, tpu.core_type = #tpu.core_type<tc>, window_params = [{transform_indices = @transform_0, window_bounds = array<i64: 512, 13>}, {pipeline_mode = #tpu.pipeline_mode<synchronous>, transform_indices = @transform_1, window_bounds = array<i64: 1, 13>}, {transform_indices = @transform_2, window_bounds = array<i64: 1>}, {transform_indices = @transform_3, window_bounds = array<i64: 512, 1>}]} {
    %c0 = arith.constant 0 : index
    %c0_0 = arith.constant 0 : index
    %0 = vector.load %arg1[%c0, %c0_0] : memref<512x13xf32, #tpu.memory_space<vmem>>, vector<512x13xf32>
    %c0_1 = arith.constant 0 : index
    %c0_2 = arith.constant 0 : index
    %1 = vector.load %arg2[%c0_1, %c0_2] : memref<1x13xf32, #tpu.memory_space<vmem>>, vector<1x13xf32>
    %2 = vector.broadcast %1 : vector<1x13xf32> to vector<512x13xf32>
    %3 = arith.mulf %0, %2 : vector<512x13xf32>
    %cst = arith.constant dense<0.000000e+00> : vector<512xf32>
    %4 = vector.multi_reduction <add>, %3, %cst [1] : vector<512x13xf32> to vector<512xf32>
    %5 = vector.shape_cast %4 : vector<512xf32> to vector<512x1xf32>
    %c0_3 = arith.constant 0 : index
    %6 = memref.load %arg3[%c0_3] : memref<1xf32, #tpu.memory_space<smem>>
    %7 = vector.broadcast %6 : f32 to vector<512x1xf32>
    %8 = arith.addf %5, %7 : vector<512x1xf32>
    %c0_4 = arith.constant 0 : index
    %c0_5 = arith.constant 0 : index
    %9 = vector.load %arg4[%c0_4, %c0_5] : memref<512x1xf32, #tpu.memory_space<vmem>>, vector<512x1xf32>
    tpu.vector_store %arg4[%c0_4, %c0_5], %8 {strides = array<i32>} : memref<512x1xf32, #tpu.memory_space<vmem>>, vector<512x1xf32>,
    return
  }
  func.func @transform_0(%arg0: i32) -> (i32, i32) {
    %c0_i32 = arith.constant 0 : i32
    %c0_i32_0 = arith.constant 0 : i32
    return %arg0, %c0_i32 : i32, i32
  }
  func.func @transform_1(%arg0: i32) -> (i32, i32) {
    %c0_i32 = arith.constant 0 : i32
    %c0_i32_0 = arith.constant 0 : i32
    %c0_i32_1 = arith.constant 0 : i32
    return %c0_i32, %c0_i32_0 : i32, i32
  }
  func.func @transform_2(%arg0: i32) -> i32 {
    %c0_i32 = arith.constant 0 : i32
    %c0_i32_0 = arith.constant 0 : i32
    return %c0_i32 : i32
  }
  func.func @transform_3(%arg0: i32) -> (i32, i32) {
    %c0_i32 = arith.constant 0 : i32
    %c0_i32_0 = arith.constant 0 : i32
    return %arg0, %c0_i32 : i32, i32
  }
}

</mosaic_0001>

<bundles_post_ra>
// kernel: tpu_custom_call.1
= control target key start
LH: loop header
LB: loop body
LE: loop exit
PB: predicated region body
PF: predicated region fallthrough
CT: control target
= control target key end

     0   :  { %vm150_vm0 = vcmask 105472   ;;  %vm409_vm1 = vcmask 7168   ;;  %s1269_s0 = inlined_call_operand.vmem [shape: f32[512,13], index: 0, kind: input, shape index: {}]   ;;  %s1270_s1 = inlined_call_operand.vmem [shape: f32[1,13], index: 1, kind: input, shape index: {}]   ;;  %s1271_s2 = inlined_call_operand.<no memory space> [shape: f32[1], index: 2, kind: input, shape index: {}]   ;;  %s1272_s3 = inlined_call_operand.vmem [shape: f32[512,1], index: 3, kind: output, shape index: {}]  }
   0x1   :  { %v17_v0 = vld [vmem:[%s1269_s0 + $0x10] sm:$0xff]  ;;  %v505_v1 = vld [vmem:[%s1270_s1] ss:$0 sm:$0xff]  ;;  %v18_v5 = vld [vmem:[%s1269_s0 + $0x18] sm:$0xff] }
   0x2   :  { %v15_v2 = vld [vmem:[%s1269_s0] sm:$0xff]  ;;  %v88_v3 = vmul.f32 %v505_v1, %v17_v0  ;;  %v16_v6 = vld [vmem:[%s1269_s0 + $0x8] sm:$0xff]  ;;  %v89_v7 = vmul.f32 %v505_v1, %v18_v5  ;;  %v22_v17 = vld [vmem:[%s1269_s0 + $0x38] sm:$0xff] }
   0x3   :  { %v86_v4 = vmul.f32 %v505_v1, %v15_v2  ;;  %v87_v8 = vmul.f32 %v505_v1, %v16_v6  ;;  %v20_v9 = vld [vmem:[%s1269_s0 + $0x28] sm:$0xff]  ;;  %v19_v10 = vld [vmem:[%s1269_s0 + $0x20] sm:$0xff]  ;;  %v21_v18 = vld [vmem:[%s1269_s0 + $0x30] sm:$0xff]  ;;  %v93_v26 = vmul.f32 %v505_v1, %v22_v17 }
   0x4   :  { %v157_v11 = vsel %vm150_vm0, %v88_v3, 0.0  ;;  %v160_v13 = vsel %vm150_vm0, %v89_v7, 0.0  ;;  %v91_v15 = vmul.f32 %v505_v1, %v20_v9  ;;  %v90_v16 = vmul.f32 %v505_v1, %v19_v10  ;;  %v24_v19 = vld [vmem:[%s1269_s0 + $0x48] sm:$0xff]  ;;  %v23_v20 = vld [vmem:[%s1269_s0 + $0x40] sm:$0xff]  ;;  %v26_v21 = vld [vmem:[%s1269_s0 + $0x58] sm:$0xff] }
   0x5   :  { %v151_v12 = vsel %vm150_vm0, %v86_v4, 0.0  ;;  %158 = vadd.xlane.f32.xlu1 %v157_v11  ;;  %v154_v14 = vsel %vm150_vm0, %v87_v8, 0.0  ;;  %v25_v22 = vld [vmem:[%s1269_s0 + $0x50] sm:$0xff]  ;;  %v28_v23 = vld [vmem:[%s1269_s0 + $0x68] sm:$0xff]  ;;  %v92_v27 = vmul.f32 %v505_v1, %v21_v18  ;;  %v27_v28 = vld [vmem:[%s1269_s0 + $0x60] sm:$0xff]  ;;  %v95_v30 = vmul.f32 %v505_v1, %v24_v19 }
   0x6   :  { %152 = vadd.xlane.f32.xlu0 %v151_v12  ;;  %v166_v24 = vsel %vm150_vm0, %v91_v15, 0.0  ;;  %v163_v25 = vsel %vm150_vm0, %v90_v16, 0.0  ;;  %v30_v29 = vld [vmem:[%s1269_s0 + $0x78] sm:$0xff]  ;;  %v94_v31 = vmul.f32 %v505_v1, %v23_v20  ;;  %v29_v32 = vld [vmem:[%s1269_s0 + $0x70] sm:$0xff]  ;;  %v97_v33 = vmul.f32 %v505_v1, %v26_v21  ;;  %v32_v41 = vld [vmem:[%s1269_s0 + $0x88] sm:$0xff] }
   0x7   :  { %v96_v34 = vmul.f32 %v505_v1, %v25_v22  ;;  %v99_v35 = vmul.f32 %v505_v1, %v28_v23  ;;  %v98_v36 = vmul.f32 %v505_v1, %v27_v28  ;;  %v101_v37 = vmul.f32 %v505_v1, %v30_v29  ;;  %v31_v42 = vld [vmem:[%s1269_s0 + $0x80] sm:$0xff]  ;;  %v34_v43 = vld [vmem:[%s1269_s0 + $0x98] sm:$0xff]  ;;  %v33_v46 = vld [vmem:[%s1269_s0 + $0x90] sm:$0xff] }
   0x8   :  { %v172_v38 = vsel %vm150_vm0, %v93_v26, 0.0  ;;  %v169_v39 = vsel %vm150_vm0, %v92_v27, 0.0  ;;  %v100_v40 = vmul.f32 %v505_v1, %v29_v32  ;;  %v178_v44 = vsel %vm150_vm0, %v95_v30, 0.0  ;;  %v48_v47 = vld [vmem:[%s1269_s0 + $0x108] sm:$0xff]  ;;  %v47_v48 = vld [vmem:[%s1269_s0 + $0x100] sm:$0xff]  ;;  %v50_v52 = vld [vmem:[%s1269_s0 + $0x118] sm:$0xff] }
   0x9   :  { %161 = vadd.xlane.f32.xlu1 %v160_v13  ;;  %v175_v45 = vsel %vm150_vm0, %v94_v31, 0.0  ;;  %v184_v49 = vsel %vm150_vm0, %v97_v33, 0.0  ;;  %v181_v50 = vsel %vm150_vm0, %v96_v34, 0.0  ;;  %v599_v51 = vsel %vm150_vm0, %v99_v35, 0.0  ;;  %v49_v53 = vld [vmem:[%s1269_s0 + $0x110] sm:$0xff]  ;;  %v52_v54 = vld [vmem:[%s1269_s0 + $0x128] sm:$0xff] }
   0xa   :  { %155 = vadd.xlane.f32.xlu0 %v154_v14  ;;  %v611_v55 = vsel %vm150_vm0, %v98_v36, 0.0  ;;  %v614_v56 = vsel %vm150_vm0, %v101_v37, 0.0  ;;  %v617_v57 = vmul.f32 %v505_v1, %v32_v41  ;;  %v620_v58 = vmul.f32 %v505_v1, %v31_v42  ;;  %v51_v59 = vld [vmem:[%s1269_s0 + $0x120] sm:$0xff]  ;;  %v54_v60 = vld [vmem:[%s1269_s0 + $0x138] sm:$0xff]  ;;  %v53_v2 = vld [vmem:[%s1269_s0 + $0x130] sm:$0xff] }
   0xb   :  { %v629_v61 = vsel %vm150_vm0, %v100_v40, 0.0  ;;  %v632_v62 = vmul.f32 %v505_v1, %v34_v43  ;;  %v119_v63 = vmul.f32 %v505_v1, %v48_v47  ;;  %v118_v0 = vmul.f32 %v505_v1, %v47_v48  ;;  %v56_v7 = vld [vmem:[%s1269_s0 + $0x148] sm:$0xff]  ;;  %v55_v8 = vld [vmem:[%s1269_s0 + $0x140] sm:$0xff]  ;;  %v58_v13 = vld [vmem:[%s1269_s0 + $0x158] sm:$0xff] }
   0xc   :  { %v640_v3 = vmul.f32 %v505_v1, %v33_v46  ;;  %v121_v4 = vmul.f32 %v505_v1, %v50_v52  ;;  %v120_v5 = vmul.f32 %v505_v1, %v49_v53  ;;  %v123_v6 = vmul.f32 %v505_v1, %v52_v54  ;;  %v57_v14 = vld [vmem:[%s1269_s0 + $0x150] sm:$0xff]  ;;  %v60_v15 = vld [vmem:[%s1269_s0 + $0x168] sm:$0xff]  ;;  %v59_v20 = vld [vmem:[%s1269_s0 + $0x160] sm:$0xff] }
   0xd   :  { %167 = vadd.xlane.f32.xlu1 %v166_v24  ;;  %v652_v9 = vsel %vm150_vm0, %v119_v63, 0.0  ;;  %v655_v10 = vsel %vm150_vm0, %v118_v0, 0.0  ;;  %v122_v11 = vmul.f32 %v505_v1, %v51_v59  ;;  %v125_v12 = vmul.f32 %v505_v1, %v54_v60  ;;  %v62_v21 = vld [vmem:[%s1269_s0 + $0x178] sm:$0xff]  ;;  %v61_v26 = vld [vmem:[%s1269_s0 + $0x170] sm:$0xff]  ;;  %v64_v31 = vld [vmem:[%s1269_s0 + $0x188] sm:$0xff] }
   0xe   :  { %164 = vadd.xlane.f32.xlu0 %v163_v25  ;;  %v669_v16 = vsel %vm150_vm0, %v121_v4, 0.0  ;;  %v672_v17 = vsel %vm150_vm0, %v120_v5, 0.0  ;;  %v675_v18 = vsel %vm150_vm0, %v123_v6, 0.0  ;;  %v124_v19 = vmul.f32 %v505_v1, %v53_v2  ;;  %v63_v32 = vld [vmem:[%s1269_s0 + $0x180] sm:$0xff]  ;;  %v66_v37 = vld [vmem:[%s1269_s0 + $0x198] sm:$0xff]  ;;  %v72_v60 = vld [vmem:[%s1269_s0 + $0x1c8] sm:$0xff] }
   0xf   :  { %v685_v22 = vsel %vm150_vm0, %v122_v11, 0.0  ;;  %v688_v23 = vsel %vm150_vm0, %v125_v12, 0.0  ;;  %v127_v24 = vmul.f32 %v505_v1, %v56_v7  ;;  %v126_v25 = vmul.f32 %v505_v1, %v55_v8  ;;  %v71_v63 = vld [vmem:[%s1269_s0 + $0x1c0] sm:$0xff]  ;;  %v74_v6 = vld [vmem:[%s1269_s0 + $0x1d8] sm:$0xff]  ;;  %v73_v7 = vld [vmem:[%s1269_s0 + $0x1d0] sm:$0xff] }
  0x10   :  { %v696_v27 = vsel %vm150_vm0, %v124_v19, 0.0  ;;  %v129_v28 = vmul.f32 %v505_v1, %v58_v13  ;;  %v128_v29 = vmul.f32 %v505_v1, %v57_v14  ;;  %v131_v30 = vmul.f32 %v505_v1, %v60_v15  ;;  %v76_v8 = vld [vmem:[%s1269_s0 + $0x1e8] sm:$0xff]  ;;  %v75_v15 = vld [vmem:[%s1269_s0 + $0x1e0] sm:$0xff] }
  0x11   :  { %173 = vadd.xlane.f32.xlu1 %v172_v38  ;;  %v708_v33 = vsel %vm150_vm0, %v127_v24, 0.0  ;;  %v711_v34 = vsel %vm150_vm0, %v126_v25, 0.0  ;;  %v130_v35 = vmul.f32 %v505_v1, %v59_v20  ;;  %v133_v36 = vmul.f32 %v505_v1, %v62_v21  ;;  %v65_v38 = vld [vmem:[%s1269_s0 + $0x190] sm:$0xff] }
  0x12   :  { %170 = vadd.xlane.f32.xlu0 %v169_v39  ;;  %v68_v39 = vld [vmem:[%s1269_s0 + $0x1a8] sm:$0xff]  ;;  %v725_v40 = vsel %vm150_vm0, %v129_v28, 0.0  ;;  %v728_v41 = vsel %vm150_vm0, %v128_v29, 0.0  ;;  %v731_v42 = vsel %vm150_vm0, %v131_v30, 0.0  ;;  %v132_v43 = vmul.f32 %v505_v1, %v61_v26  ;;  %v77_v24 = vld [vmem:[%s1269_s0 + $0x1f0] sm:$0xff] }
  0x13   :  { %v741_v46 = vsel %vm150_vm0, %v130_v35, 0.0  ;;  %v744_v47 = vsel %vm150_vm0, %v133_v36, 0.0  ;;  %v135_v48 = vmul.f32 %v505_v1, %v64_v31  ;;  %v137_v53 = vmul.f32 %v505_v1, %v66_v37 }
  0x14   :  { %v752_v52 = vsel %vm150_vm0, %v132_v43, 0.0  ;;  %v136_v54 = vmul.f32 %v505_v1, %v65_v38  ;;  %v139_v59 = vmul.f32 %v505_v1, %v68_v39  ;;  %v143_v20 = vmul.f32 %v505_v1, %v72_v60 }
  0x15   :  { %179 = vadd.xlane.f32.xlu1 %v178_v44  ;;  %v67_v44 = vld [vmem:[%s1269_s0 + $0x1a0] sm:$0xff]  ;;  %v764_v0 = vsel %vm150_vm0, %v135_v48, 0.0  ;;  %v783_v11 = vsel %vm150_vm0, %v137_v53, 0.0  ;;  %v142_v21 = vmul.f32 %v505_v1, %v71_v63  ;;  %v145_v26 = vmul.f32 %v505_v1, %v74_v6 }
  0x16   :  { %176 = vadd.xlane.f32.xlu0 %v175_v45  ;;  %v70_v45 = vld [vmem:[%s1269_s0 + $0x1b8] sm:$0xff]  ;;  %v138_v4 = vmul.f32 %v505_v1, %v67_v44  ;;  %v786_v12 = vsel %vm150_vm0, %v136_v54, 0.0  ;;  %v789_v13 = vsel %vm150_vm0, %v139_v59, 0.0  ;;  %v144_v28 = vmul.f32 %v505_v1, %v73_v7  ;;  %v35_v48 = vld [vmem:[%s1269_s0 + $0xa0] sm:$0xff]  ;;  %v37_v59 = vld [vmem:[%s1269_s0 + $0xb0] sm:$0xff] }
  0x17   :  { %v141_v5 = vmul.f32 %v505_v1, %v70_v45  ;;  %v147_v29 = vmul.f32 %v505_v1, %v76_v8  ;;  %v816_v30 = vsel %vm150_vm0, %v143_v20, 0.0  ;;  %v819_v31 = vsel %vm150_vm0, %v142_v21, 0.0  ;;  %v36_v45 = vld [vmem:[%s1269_s0 + $0xa8] sm:$0xff]  ;;  %v38_v54 = vld [vmem:[%s1269_s0 + $0xb8] sm:$0xff] }
  0x18   :  { %v826_v36 = vsel %vm150_vm0, %v145_v26, 0.0  ;;  %v829_v37 = vsel %vm150_vm0, %v144_v28, 0.0  ;;  %v148_v39 = vmul.f32 %v505_v1, %v77_v24  ;;  %v202_v43 = vsel %vm150_vm0, %v617_v57, 0.0  ;;  %v44_v28 = vld [vmem:[%s1269_s0 + $0xe8] sm:$0xff] }
  0x19   :  { %185 = vadd.xlane.f32.xlu1 %v184_v49  ;;  %v134_v49 = vmul.f32 %v505_v1, %v63_v32  ;;  %v802_v19 = vsel %vm150_vm0, %v141_v5, 0.0  ;;  %v146_v32 = vmul.f32 %v505_v1, %v75_v15  ;;  %v832_v38 = vsel %vm150_vm0, %v147_v29, 0.0  ;;  %v39_v5 = vld [vmem:[%s1269_s0 + $0xc0] sm:$0xff]  ;;  %v42_v15 = vld [vmem:[%s1269_s0 + $0xd8] sm:$0xff] }
  0x1a   :  { %182 = vadd.xlane.f32.xlu0 %v181_v50  ;;  %v69_v50 = vld [vmem:[%s1269_s0 + $0x1b0] sm:$0xff]  ;;  %v199_v44 = vsel %vm150_vm0, %v620_v58, 0.0  ;;  %v208_v57 = vsel %vm150_vm0, %v632_v62, 0.0  ;;  %v205_v58 = vsel %vm150_vm0, %v640_v3, 0.0  ;;  %v106_v53 = vmul.f32 %v505_v1, %v35_v48  ;;  %v43_v29 = vld [vmem:[%s1269_s0 + $0xe0] sm:$0xff] }
  0x1b   :  { %v767_v2 = vsel %vm150_vm0, %v134_v49, 0.0  ;;  %v140_v14 = vmul.f32 %v505_v1, %v69_v50  ;;  %v852_v49 = vsel %vm150_vm0, %v148_v39, 0.0  ;;  %v107_v50 = vmul.f32 %v505_v1, %v36_v45  ;;  %v45_v45 = vld [vmem:[%s1269_s0 + $0xf0] sm:$0xff] }
  0x1c   :  { %v211_v62 = vsel %vm150_vm0, %v106_v53, 0.0  ;;  %v109_v3 = vmul.f32 %v505_v1, %v38_v54  ;;  %v108_v63 = vmul.f32 %v505_v1, %v37_v59  ;;  %v113_v24 = vmul.f32 %v505_v1, %v42_v15 }
  0x1d   :  { %191 = vadd.xlane.f32.xlu1 %v599_v51  ;;  %v78_v51 = vld [vmem:[%s1269_s0 + $0x1f8] sm:$0xff]  ;;  %v810_v25 = vsel %vm150_vm0, %v140_v14, 0.0  ;;  %v214_v60 = vsel %vm150_vm0, %v107_v50, 0.0  ;;  %v110_v14 = vmul.f32 %v505_v1, %v39_v5  ;;  %v115_v39 = vmul.f32 %v505_v1, %v44_v28 }
  0x1e   :  { %188 = vadd.xlane.f32.xlu0 %v611_v55  ;;  %v799_v55 = vsel %vm150_vm0, %v138_v4, 0.0  ;;  %v149_v35 = vmul.f32 %v505_v1, %v78_v51  ;;  %v40_v4 = vld [vmem:[%s1269_s0 + $0xc8] sm:$0xff]  ;;  %v220_v6 = vsel %vm150_vm0, %v109_v3, 0.0  ;;  %v217_v7 = vsel %vm150_vm0, %v108_v63, 0.0  ;;  %v41_v51 = vld [vmem:[%s1269_s0 + $0xd0] sm:$0xff] }
  0x1f   :  { %v111_v8 = vmul.f32 %v505_v1, %v40_v4  ;;  %v223_v21 = vsel %vm150_vm0, %v110_v14, 0.0  ;;  %v112_v26 = vmul.f32 %v505_v1, %v41_v51  ;;  %v238_v48 = vsel %vm150_vm0, %v115_v39, 0.0 }
  0x20   :  { %v116_v50 = vmul.f32 %v505_v1, %v45_v45 }
  0x21   :  { %197 = vadd.xlane.f32.xlu1 %v614_v56  ;;  %v840_v56 = vsel %vm150_vm0, %v146_v32, 0.0  ;;  %v226_v20 = vsel %vm150_vm0, %v111_v8, 0.0  ;;  %v232_v32 = vsel %vm150_vm0, %v113_v24, 0.0 }
  0x22   :  { %194 = vadd.xlane.f32.xlu0 %v629_v61  ;;  %v843_v61 = vsel %vm150_vm0, %v149_v35, 0.0  ;;  %v229_v35 = vsel %vm150_vm0, %v112_v26, 0.0  ;;  %v241_v54 = vsel %vm150_vm0, %v116_v50, 0.0 }
  0x25   :  { %203 = vadd.xlane.f32.xlu1 %v202_v43  ;;  %v114_v43 = vmul.f32 %v505_v1, %v43_v29 }
  0x26   :  { %200 = vadd.xlane.f32.xlu0 %v199_v44  ;;  %v46_v44 = vld [vmem:[%s1269_s0 + $0xf8] sm:$0xff] }
  0x29   :  { %209 = vadd.xlane.f32.xlu1 %v208_v57  ;;  %v235_v57 = vsel %vm150_vm0, %v114_v43, 0.0 }
  0x2a   :  { %206 = vadd.xlane.f32.xlu0 %v205_v58  ;;  %v117_v58 = vmul.f32 %v505_v1, %v46_v44  ;;  %v947_v1 = vstv %s1271_s2 }
  0x2c   :  { %v244_v53 = vsel %vm150_vm0, %v117_v58, 0.0 }
  0x2d   :  { %215 = vadd.xlane.f32.xlu1 %v214_v60 }
  0x2e   :  { %212 = vadd.xlane.f32.xlu0 %v211_v62 }
  0x31   :  { %221 = vadd.xlane.f32.xlu1 %v220_v6 }
  0x32   :  { %218 = vadd.xlane.f32.xlu0 %v217_v7 }
  0x35   :  { %227 = vadd.xlane.f32.xlu1 %v226_v20 }
  0x36   :  { %224 = vadd.xlane.f32.xlu0 %v223_v21 }
  0x39   :  { %233 = vadd.xlane.f32.xlu1 %v232_v32 }
  0x3a   :  { %230 = vadd.xlane.f32.xlu0 %v229_v35 }
  0x3d   :  { %239 = vadd.xlane.f32.xlu1 %v238_v48 }
  0x3e   :  { %236 = vadd.xlane.f32.xlu0 %v235_v57 }
  0x41   :  { %245 = vadd.xlane.f32.xlu1 %v244_v53 }
  0x42   :  { %242 = vadd.xlane.f32.xlu0 %v241_v54 }
  0x45   :  { %251 = vadd.xlane.f32.xlu1 %v652_v9 }
  0x46   :  { %248 = vadd.xlane.f32.xlu0 %v655_v10 }
  0x49   :  { %257 = vadd.xlane.f32.xlu1 %v669_v16 }
  0x4a   :  { %254 = vadd.xlane.f32.xlu0 %v672_v17 }
  0x4d   :  { %263 = vadd.xlane.f32.xlu1 %v675_v18 }
  0x4e   :  { %260 = vadd.xlane.f32.xlu0 %v685_v22 }
  0x51   :  { %269 = vadd.xlane.f32.xlu1 %v688_v23 }
  0x52   :  { %266 = vadd.xlane.f32.xlu0 %v696_v27 }
  0x55   :  { %275 = vadd.xlane.f32.xlu1 %v708_v33 }
  0x56   :  { %272 = vadd.xlane.f32.xlu0 %v711_v34 }
  0x59   :  { %281 = vadd.xlane.f32.xlu1 %v725_v40 }
  0x5a   :  { %278 = vadd.xlane.f32.xlu0 %v728_v41 }
  0x5d   :  { %287 = vadd.xlane.f32.xlu1 %v731_v42 }
  0x5e   :  { %284 = vadd.xlane.f32.xlu0 %v741_v46 }
  0x61   :  { %293 = vadd.xlane.f32.xlu1 %v744_v47 }
  0x62   :  { %290 = vadd.xlane.f32.xlu0 %v752_v52 }
  0x65   :  { %299 = vadd.xlane.f32.xlu1 %v764_v0 }
  0x66   :  { %296 = vadd.xlane.f32.xlu0 %v767_v2 }
  0x69   :  { %305 = vadd.xlane.f32.xlu1 %v783_v11 }
  0x6a   :  { %302 = vadd.xlane.f32.xlu0 %v786_v12 }
  0x6d   :  { %311 = vadd.xlane.f32.xlu1 %v789_v13 }
  0x6e   :  { %308 = vadd.xlane.f32.xlu0 %v799_v55 }
  0x71   :  { %317 = vadd.xlane.f32.xlu1 %v802_v19 }
  0x72   :  { %314 = vadd.xlane.f32.xlu0 %v810_v25 }
  0x75   :  { %323 = vadd.xlane.f32.xlu1 %v816_v30 }
  0x76   :  { %320 = vadd.xlane.f32.xlu0 %v819_v31 }
  0x79   :  { %329 = vadd.xlane.f32.xlu1 %v826_v36 }
  0x7a   :  { %326 = vadd.xlane.f32.xlu0 %v829_v37 }
  0x7d   :  { %335 = vadd.xlane.f32.xlu1 %v832_v38 }
  0x7e   :  { %332 = vadd.xlane.f32.xlu0 %v840_v56 }
  0x81   :  { %341 = vadd.xlane.f32.xlu1 %v843_v61 }
  0x82   :  { %338 = vadd.xlane.f32.xlu0 %v852_v49 }
  0x92   :  { %v159_v9 = vpop.xlane.xlu1 %158 }
  0x93   :  { %v153_v10 = vpop.xlane.xlu0 %152  ;;  %v347_v16 = vadd.f32 %v947_v1, %v159_v9 }
  0x94   :  { %v345_v17 = vadd.f32 %v947_v1, %v153_v10 }
  0x95   :  { %412 = vst.msk [vmem:[%s1272_s3 + $0x10] sm:$0xff] %vm409_vm1, %v347_v16 }
  0x96   :  { %410 = vst.msk [vmem:[%s1272_s3] sm:$0xff] %vm409_vm1, %v345_v17  ;;  %v162_v18 = vpop.xlane.xlu1 %161 }
  0x97   :  { %v156_v22 = vpop.xlane.xlu0 %155  ;;  %v348_v23 = vadd.f32 %v947_v1, %v162_v18 }
  0x98   :  { %v346_v27 = vadd.f32 %v947_v1, %v156_v22 }
  0x99   :  { %413 = vst.msk [vmem:[%s1272_s3 + $0x18] sm:$0xff] %vm409_vm1, %v348_v23 }
  0x9a   :  { %411 = vst.msk [vmem:[%s1272_s3 + $0x8] sm:$0xff] %vm409_vm1, %v346_v27  ;;  %v168_v33 = vpop.xlane.xlu1 %167 }
  0x9b   :  { %v165_v34 = vpop.xlane.xlu0 %164  ;;  %v350_v40 = vadd.f32 %v947_v1, %v168_v33 }
  0x9c   :  { %v349_v41 = vadd.f32 %v947_v1, %v165_v34 }
  0x9d   :  { %415 = vst.msk [vmem:[%s1272_s3 + $0x28] sm:$0xff] %vm409_vm1, %v350_v40 }
  0x9e   :  { %414 = vst.msk [vmem:[%s1272_s3 + $0x20] sm:$0xff] %vm409_vm1, %v349_v41  ;;  %v174_v42 = vpop.xlane.xlu1 %173 }
  0x9f   :  { %v171_v46 = vpop.xlane.xlu0 %170  ;;  %v352_v47 = vadd.f32 %v947_v1, %v174_v42 }
  0xa0   :  { %v351_v52 = vadd.f32 %v947_v1, %v171_v46 }
  0xa1   :  { %417 = vst.msk [vmem:[%s1272_s3 + $0x38] sm:$0xff] %vm409_vm1, %v352_v47 }
  0xa2   :  { %416 = vst.msk [vmem:[%s1272_s3 + $0x30] sm:$0xff] %vm409_vm1, %v351_v52  ;;  %v180_v0 = vpop.xlane.xlu1 %179 }
  0xa3   :  { %v177_v2 = vpop.xlane.xlu0 %176  ;;  %v354_v11 = vadd.f32 %v947_v1, %v180_v0 }
  0xa4   :  { %v353_v12 = vadd.f32 %v947_v1, %v177_v2 }
  0xa5   :  { %419 = vst.msk [vmem:[%s1272_s3 + $0x48] sm:$0xff] %vm409_vm1, %v354_v11 }
  0xa6   :  { %418 = vst.msk [vmem:[%s1272_s3 + $0x40] sm:$0xff] %vm409_vm1, %v353_v12  ;;  %v186_v13 = vpop.xlane.xlu1 %185 }
  0xa7   :  { %v183_v55 = vpop.xlane.xlu0 %182  ;;  %v356_v19 = vadd.f32 %v947_v1, %v186_v13 }
  0xa8   :  { %v355_v25 = vadd.f32 %v947_v1, %v183_v55 }
  0xa9   :  { %421 = vst.msk [vmem:[%s1272_s3 + $0x58] sm:$0xff] %vm409_vm1, %v356_v19 }
  0xaa   :  { %420 = vst.msk [vmem:[%s1272_s3 + $0x50] sm:$0xff] %vm409_vm1, %v355_v25  ;;  %v192_v30 = vpop.xlane.xlu1 %191 }
  0xab   :  { %v189_v31 = vpop.xlane.xlu0 %188  ;;  %v358_v36 = vadd.f32 %v947_v1, %v192_v30 }
  0xac   :  { %v357_v37 = vadd.f32 %v947_v1, %v189_v31 }
  0xad   :  { %423 = vst.msk [vmem:[%s1272_s3 + $0x68] sm:$0xff] %vm409_vm1, %v358_v36 }
  0xae   :  { %422 = vst.msk [vmem:[%s1272_s3 + $0x60] sm:$0xff] %vm409_vm1, %v357_v37  ;;  %v198_v38 = vpop.xlane.xlu1 %197 }
  0xaf   :  { %v195_v56 = vpop.xlane.xlu0 %194  ;;  %v360_v61 = vadd.f32 %v947_v1, %v198_v38 }
  0xb0   :  { %v359_v49 = vadd.f32 %v947_v1, %v195_v56 }
  0xb1   :  { %425 = vst.msk [vmem:[%s1272_s3 + $0x78] sm:$0xff] %vm409_vm1, %v360_v61 }
  0xb2   :  { %424 = vst.msk [vmem:[%s1272_s3 + $0x70] sm:$0xff] %vm409_vm1, %v359_v49  ;;  %v204_v59 = vpop.xlane.xlu1 %203 }
  0xb3   :  { %v201_v60 = vpop.xlane.xlu0 %200  ;;  %v362_v62 = vadd.f32 %v947_v1, %v204_v59 }
  0xb4   :  { %v361_v3 = vadd.f32 %v947_v1, %v201_v60 }
  0xb5   :  { %427 = vst.msk [vmem:[%s1272_s3 + $0x88] sm:$0xff] %vm409_vm1, %v362_v62 }
  0xb6   :  { %426 = vst.msk [vmem:[%s1272_s3 + $0x80] sm:$0xff] %vm409_vm1, %v361_v3  ;;  %v210_v63 = vpop.xlane.xlu1 %209 }
  0xb7   :  { %v207_v4 = vpop.xlane.xlu0 %206  ;;  %v364_v5 = vadd.f32 %v947_v1, %v210_v63 }
  0xb8   :  { %v363_v6 = vadd.f32 %v947_v1, %v207_v4 }
  0xb9   :  { %429 = vst.msk [vmem:[%s1272_s3 + $0x98] sm:$0xff] %vm409_vm1, %v364_v5 }
  0xba   :  { %428 = vst.msk [vmem:[%s1272_s3 + $0x90] sm:$0xff] %vm409_vm1, %v363_v6  ;;  %v216_v7 = vpop.xlane.xlu1 %215 }
  0xbb   :  { %v213_v8 = vpop.xlane.xlu0 %212  ;;  %v366_v14 = vadd.f32 %v947_v1, %v216_v7 }
  0xbc   :  { %v365_v15 = vadd.f32 %v947_v1, %v213_v8 }
  0xbd   :  { %431 = vst.msk [vmem:[%s1272_s3 + $0xa8] sm:$0xff] %vm409_vm1, %v366_v14 }
  0xbe   :  { %430 = vst.msk [vmem:[%s1272_s3 + $0xa0] sm:$0xff] %vm409_vm1, %v365_v15  ;;  %v222_v51 = vpop.xlane.xlu1 %221 }
  0xbf   :  { %v219_v20 = vpop.xlane.xlu0 %218  ;;  %v368_v21 = vadd.f32 %v947_v1, %v222_v51 }
  0xc0   :  { %v367_v24 = vadd.f32 %v947_v1, %v219_v20 }
  0xc1   :  { %433 = vst.msk [vmem:[%s1272_s3 + $0xb8] sm:$0xff] %vm409_vm1, %v368_v21 }
  0xc2   :  { %432 = vst.msk [vmem:[%s1272_s3 + $0xb0] sm:$0xff] %vm409_vm1, %v367_v24  ;;  %v228_v26 = vpop.xlane.xlu1 %227 }
  0xc3   :  { %v225_v28 = vpop.xlane.xlu0 %224  ;;  %v370_v29 = vadd.f32 %v947_v1, %v228_v26 }
  0xc4   :  { %v369_v32 = vadd.f32 %v947_v1, %v225_v28 }
  0xc5   :  { %435 = vst.msk [vmem:[%s1272_s3 + $0xc8] sm:$0xff] %vm409_vm1, %v370_v29 }
  0xc6   :  { %434 = vst.msk [vmem:[%s1272_s3 + $0xc0] sm:$0xff] %vm409_vm1, %v369_v32  ;;  %v234_v35 = vpop.xlane.xlu1 %233 }
  0xc7   :  { %v231_v39 = vpop.xlane.xlu0 %230  ;;  %v372_v43 = vadd.f32 %v947_v1, %v234_v35 }
  0xc8   :  { %v371_v44 = vadd.f32 %v947_v1, %v231_v39 }
  0xc9   :  { %437 = vst.msk [vmem:[%s1272_s3 + $0xd8] sm:$0xff] %vm409_vm1, %v372_v43 }
  0xca   :  { %436 = vst.msk [vmem:[%s1272_s3 + $0xd0] sm:$0xff] %vm409_vm1, %v371_v44  ;;  %v240_v45 = vpop.xlane.xlu1 %239 }
  0xcb   :  { %v237_v48 = vpop.xlane.xlu0 %236  ;;  %v374_v57 = vadd.f32 %v947_v1, %v240_v45 }
  0xcc   :  { %v373_v58 = vadd.f32 %v947_v1, %v237_v48 }
  0xcd   :  { %439 = vst.msk [vmem:[%s1272_s3 + $0xe8] sm:$0xff] %vm409_vm1, %v374_v57 }
  0xce   :  { %438 = vst.msk [vmem:[%s1272_s3 + $0xe0] sm:$0xff] %vm409_vm1, %v373_v58  ;;  %v246_v50 = vpop.xlane.xlu1 %245 }
  0xcf   :  { %v243_v53 = vpop.xlane.xlu0 %242  ;;  %v376_v54 = vadd.f32 %v947_v1, %v246_v50 }
  0xd0   :  { %v375_v9 = vadd.f32 %v947_v1, %v243_v53 }
  0xd1   :  { %441 = vst.msk [vmem:[%s1272_s3 + $0xf8] sm:$0xff] %vm409_vm1, %v376_v54 }
  0xd2   :  { %440 = vst.msk [vmem:[%s1272_s3 + $0xf0] sm:$0xff] %vm409_vm1, %v375_v9  ;;  %v252_v10 = vpop.xlane.xlu1 %251 }
  0xd3   :  { %v249_v16 = vpop.xlane.xlu0 %248  ;;  %v378_v17 = vadd.f32 %v947_v1, %v252_v10 }
  0xd4   :  { %v377_v18 = vadd.f32 %v947_v1, %v249_v16 }
  0xd5   :  { %443 = vst.msk [vmem:[%s1272_s3 + $0x108] sm:$0xff] %vm409_vm1, %v378_v17 }
  0xd6   :  { %442 = vst.msk [vmem:[%s1272_s3 + $0x100] sm:$0xff] %vm409_vm1, %v377_v18  ;;  %v258_v22 = vpop.xlane.xlu1 %257 }
  0xd7   :  { %v255_v23 = vpop.xlane.xlu0 %254  ;;  %v380_v27 = vadd.f32 %v947_v1, %v258_v22 }
  0xd8   :  { %v379_v33 = vadd.f32 %v947_v1, %v255_v23 }
  0xd9   :  { %445 = vst.msk [vmem:[%s1272_s3 + $0x118] sm:$0xff] %vm409_vm1, %v380_v27 }
  0xda   :  { %444 = vst.msk [vmem:[%s1272_s3 + $0x110] sm:$0xff] %vm409_vm1, %v379_v33  ;;  %v264_v34 = vpop.xlane.xlu1 %263 }
  0xdb   :  { %v261_v40 = vpop.xlane.xlu0 %260  ;;  %v382_v41 = vadd.f32 %v947_v1, %v264_v34 }
  0xdc   :  { %v381_v42 = vadd.f32 %v947_v1, %v261_v40 }
  0xdd   :  { %447 = vst.msk [vmem:[%s1272_s3 + $0x128] sm:$0xff] %vm409_vm1, %v382_v41 }
  0xde   :  { %446 = vst.msk [vmem:[%s1272_s3 + $0x120] sm:$0xff] %vm409_vm1, %v381_v42  ;;  %v270_v46 = vpop.xlane.xlu1 %269 }
  0xdf   :  { %v267_v47 = vpop.xlane.xlu0 %266  ;;  %v384_v52 = vadd.f32 %v947_v1, %v270_v46 }
  0xe0   :  { %v383_v0 = vadd.f32 %v947_v1, %v267_v47 }
  0xe1   :  { %449 = vst.msk [vmem:[%s1272_s3 + $0x138] sm:$0xff] %vm409_vm1, %v384_v52 }
  0xe2   :  { %448 = vst.msk [vmem:[%s1272_s3 + $0x130] sm:$0xff] %vm409_vm1, %v383_v0  ;;  %v276_v2 = vpop.xlane.xlu1 %275 }
  0xe3   :  { %v273_v11 = vpop.xlane.xlu0 %272  ;;  %v386_v12 = vadd.f32 %v947_v1, %v276_v2 }
  0xe4   :  { %v385_v13 = vadd.f32 %v947_v1, %v273_v11 }
  0xe5   :  { %451 = vst.msk [vmem:[%s1272_s3 + $0x148] sm:$0xff] %vm409_vm1, %v386_v12 }
  0xe6   :  { %450 = vst.msk [vmem:[%s1272_s3 + $0x140] sm:$0xff] %vm409_vm1, %v385_v13  ;;  %v282_v55 = vpop.xlane.xlu1 %281 }
  0xe7   :  { %v279_v19 = vpop.xlane.xlu0 %278  ;;  %v388_v25 = vadd.f32 %v947_v1, %v282_v55 }
  0xe8   :  { %v387_v30 = vadd.f32 %v947_v1, %v279_v19 }
  0xe9   :  { %453 = vst.msk [vmem:[%s1272_s3 + $0x158] sm:$0xff] %vm409_vm1, %v388_v25 }
  0xea   :  { %452 = vst.msk [vmem:[%s1272_s3 + $0x150] sm:$0xff] %vm409_vm1, %v387_v30  ;;  %v288_v31 = vpop.xlane.xlu1 %287 }
  0xeb   :  { %v285_v36 = vpop.xlane.xlu0 %284  ;;  %v390_v37 = vadd.f32 %v947_v1, %v288_v31 }
  0xec   :  { %v389_v38 = vadd.f32 %v947_v1, %v285_v36 }
  0xed   :  { %455 = vst.msk [vmem:[%s1272_s3 + $0x168] sm:$0xff] %vm409_vm1, %v390_v37 }
  0xee   :  { %454 = vst.msk [vmem:[%s1272_s3 + $0x160] sm:$0xff] %vm409_vm1, %v389_v38  ;;  %v294_v56 = vpop.xlane.xlu1 %293 }
  0xef   :  { %v291_v61 = vpop.xlane.xlu0 %290  ;;  %v392_v49 = vadd.f32 %v947_v1, %v294_v56 }
  0xf0   :  { %v391_v59 = vadd.f32 %v947_v1, %v291_v61 }
  0xf1   :  { %457 = vst.msk [vmem:[%s1272_s3 + $0x178] sm:$0xff] %vm409_vm1, %v392_v49 }
  0xf2   :  { %456 = vst.msk [vmem:[%s1272_s3 + $0x170] sm:$0xff] %vm409_vm1, %v391_v59  ;;  %v300_v60 = vpop.xlane.xlu1 %299 }
  0xf3   :  { %v297_v62 = vpop.xlane.xlu0 %296  ;;  %v394_v3 = vadd.f32 %v947_v1, %v300_v60 }
  0xf4   :  { %v393_v63 = vadd.f32 %v947_v1, %v297_v62 }
  0xf5   :  { %459 = vst.msk [vmem:[%s1272_s3 + $0x188] sm:$0xff] %vm409_vm1, %v394_v3 }
  0xf6   :  { %458 = vst.msk [vmem:[%s1272_s3 + $0x180] sm:$0xff] %vm409_vm1, %v393_v63  ;;  %v306_v4 = vpop.xlane.xlu1 %305 }
  0xf7   :  { %v303_v5 = vpop.xlane.xlu0 %302  ;;  %v396_v6 = vadd.f32 %v947_v1, %v306_v4 }
  0xf8   :  { %v395_v7 = vadd.f32 %v947_v1, %v303_v5 }
  0xf9   :  { %461 = vst.msk [vmem:[%s1272_s3 + $0x198] sm:$0xff] %vm409_vm1, %v396_v6 }
  0xfa   :  { %460 = vst.msk [vmem:[%s1272_s3 + $0x190] sm:$0xff] %vm409_vm1, %v395_v7  ;;  %v312_v8 = vpop.xlane.xlu1 %311 }
  0xfb   :  { %v309_v14 = vpop.xlane.xlu0 %308  ;;  %v398_v15 = vadd.f32 %v947_v1, %v312_v8 }
  0xfc   :  { %v397_v51 = vadd.f32 %v947_v1, %v309_v14 }
  0xfd   :  { %463 = vst.msk [vmem:[%s1272_s3 + $0x1a8] sm:$0xff] %vm409_vm1, %v398_v15 }
  0xfe   :  { %462 = vst.msk [vmem:[%s1272_s3 + $0x1a0] sm:$0xff] %vm409_vm1, %v397_v51  ;;  %v318_v20 = vpop.xlane.xlu1 %317 }
  0xff   :  { %v315_v21 = vpop.xlane.xlu0 %314  ;;  %v400_v24 = vadd.f32 %v947_v1, %v318_v20 }
 0x100   :  { %v399_v26 = vadd.f32 %v947_v1, %v315_v21 }
 0x101   :  { %465 = vst.msk [vmem:[%s1272_s3 + $0x1b8] sm:$0xff] %vm409_vm1, %v400_v24 }
 0x102   :  { %464 = vst.msk [vmem:[%s1272_s3 + $0x1b0] sm:$0xff] %vm409_vm1, %v399_v26  ;;  %v324_v28 = vpop.xlane.xlu1 %323 }
 0x103   :  { %v321_v29 = vpop.xlane.xlu0 %320  ;;  %v402_v32 = vadd.f32 %v947_v1, %v324_v28 }
 0x104   :  { %v401_v35 = vadd.f32 %v947_v1, %v321_v29 }
 0x105   :  { %467 = vst.msk [vmem:[%s1272_s3 + $0x1c8] sm:$0xff] %vm409_vm1, %v402_v32 }
 0x106   :  { %466 = vst.msk [vmem:[%s1272_s3 + $0x1c0] sm:$0xff] %vm409_vm1, %v401_v35  ;;  %v330_v39 = vpop.xlane.xlu1 %329 }
 0x107   :  { %v327_v43 = vpop.xlane.xlu0 %326  ;;  %v404_v44 = vadd.f32 %v947_v1, %v330_v39 }
 0x108   :  { %v403_v45 = vadd.f32 %v947_v1, %v327_v43 }
 0x109   :  { %469 = vst.msk [vmem:[%s1272_s3 + $0x1d8] sm:$0xff] %vm409_vm1, %v404_v44 }
 0x10a   :  { %468 = vst.msk [vmem:[%s1272_s3 + $0x1d0] sm:$0xff] %vm409_vm1, %v403_v45  ;;  %v336_v48 = vpop.xlane.xlu1 %335 }
 0x10b   :  { %v333_v57 = vpop.xlane.xlu0 %332  ;;  %v406_v58 = vadd.f32 %v947_v1, %v336_v48 }
 0x10c   :  { %v405_v50 = vadd.f32 %v947_v1, %v333_v57 }
 0x10d   :  { %471 = vst.msk [vmem:[%s1272_s3 + $0x1e8] sm:$0xff] %vm409_vm1, %v406_v58 }
 0x10e   :  { %470 = vst.msk [vmem:[%s1272_s3 + $0x1e0] sm:$0xff] %vm409_vm1, %v405_v50  ;;  %v342_v53 = vpop.xlane.xlu1 %341 }
 0x10f   :  { %v339_v54 = vpop.xlane.xlu0 %338  ;;  %v408_v9 = vadd.f32 %v947_v1, %v342_v53 }
 0x110   :  { %v407_v10 = vadd.f32 %v947_v1, %v339_v54 }
 0x111   :  { %473 = vst.msk [vmem:[%s1272_s3 + $0x1f8] sm:$0xff] %vm409_vm1, %v408_v9 }
 0x112   :  { %472 = vst.msk [vmem:[%s1272_s3 + $0x1f0] sm:$0xff] %vm409_vm1, %v407_v10 }

</bundles_post_ra>
